<compile_context>
chip_gen: v5e
topology: v5e:2x2
jax: 0.10.0
libtpu: 0.0.40
codegen_flags: <defaults>
</compile_context>

<pallas_src>
import functools

import jax
import jax.numpy as jnp
from jax.experimental import pallas as pl
from jax.experimental.pallas import tpu as pltpu


def _round_up(x, m):
    return (x + m - 1) // m * m


# ---------------- pass 1: conv as one packed-K matmul + per-tile centered BN partials ----------
def _conv_stats_kernel(p_ref, w_ref, y_ref, stat_ref, acc_ref, *, tm, rows_valid):
    """
    p_ref   : (TM, K_pad)        bf16  im2col rows (9 taps packed along K)
    w_ref   : (K_pad, C_out_pad) bf16  packed conv weights
    y_ref   : (TM, C_out_pad)    bf16  un-normalized conv output (lane-dense store)
    stat_ref: (1, 2, C_out_pad)  f32   row0 = channel sum, row1 = centered sum-of-squares
    acc_ref : (TM, C_out_pad)    f32   VMEM scratch accumulator
    """
    i = pl.program_id(0)

    # single MXU matmul per tile (bf16 operands, f32 accumulation into VMEM scratch)
    acc_ref[...] = jnp.dot(p_ref[...], w_ref[...], preferred_element_type=jnp.float32)
    y_ref[...] = acc_ref[...].astype(y_ref.dtype)

    # per-tile BN partials; mask out zero-padded tail rows of the last tile
    valid_i = jnp.minimum(tm, rows_valid - i * tm)                       # int32 scalar
    rowmask = (jax.lax.broadcasted_iota(jnp.int32, (tm, 1), 0)
               < valid_i).astype(jnp.float32)
    s = jnp.sum(acc_ref[...] * rowmask, axis=0, keepdims=True)           # (1, C) channel sum
    mu = s / valid_i.astype(jnp.float32)
    d = (acc_ref[...] - mu) * rowmask
    m2 = jnp.sum(d * d, axis=0, keepdims=True)                           # centered sumsq
    stat_ref[0] = jnp.concatenate([s, m2], axis=0)                       # only the 2 used rows


# ---------------- pass 2: y * scale + shift, then ReLU6 ----------------------------------------
def _bn_relu6_kernel(y_ref, scale_ref, shift_ref, z_ref):
    z = y_ref[...].astype(jnp.float32) * scale_ref[...] + shift_ref[...]
    z_ref[...] = jnp.clip(z, 0.0, 6.0)


@jax.jit
def conv_block_forward(x_nchw, weight, bias, gamma, beta, eps=1e-5):
    """x_nchw: (N, C_in, H, W). weight: (C_out, C_in, 3, 3). Returns (N, C_out, H, W)."""
    del bias  # TODO(synk): conv bias cancels only under training-mode BN; reinstate for eval mode.
    N, C_in, H, W = x_nchw.shape
    C_out = weight.shape[0]
    assert H >= 2 and W >= 2, "reflect padding of 1 requires H, W >= 2"

    K = 9 * C_in
    K_pad = _round_up(K, 128)
    C_out_pad = _round_up(C_out, 128)

    R = N * H * W                                          # output pixels = matmul rows
    TM = 512 if R >= 1024 else max(8, _round_up((R + 1) // 2, 8))   # big M, >=2 blocks when possible
    n_tiles = -(-R // TM)                                  # cdiv; remainder rows are zero-padded+masked
    R_pad = n_tiles * TM

    # ---- layout plumbing: NCHW -> NHWC, reflect pad, im2col with taps packed along K ----
    x = jnp.transpose(x_nchw, (0, 2, 3, 1)).astype(jnp.float32)
    xpad = jnp.pad(x, ((0, 0), (1, 1), (1, 1), (0, 0)), mode="reflect")
    taps = [xpad[:, kh:kh + H, kw:kw + W, :] for kh in range(3) for kw in range(3)]
    p = jnp.concatenate(taps, axis=-1).reshape(R, K)                     # (R, 9*C_in)
    p = jnp.pad(p, ((0, R_pad - R), (0, K_pad - K))).astype(jnp.bfloat16)

    # weights (C_out, C_in, 3, 3) -> (kh, kw, ci, co) -> (9*C_in, C_out), padded once to (K_pad, C_out_pad)
    w = jnp.transpose(weight, (2, 3, 1, 0)).reshape(K, C_out).astype(jnp.float32)
    w = jnp.pad(w, ((0, K_pad - K), (0, C_out_pad - C_out))).astype(jnp.bfloat16)

    cparams = pltpu.CompilerParams(dimension_semantics=("parallel",),
                                   vmem_limit_bytes=48 * 1024 * 1024)

    # ---- pass 1: conv + per-tile channel partials ----
    y, stats = pl.pallas_call(
        functools.partial(_conv_stats_kernel, tm=TM, rows_valid=R),
        grid=(n_tiles,),
        in_specs=[
            pl.BlockSpec((TM, K_pad), lambda i: (i, 0)),
            pl.BlockSpec((K_pad, C_out_pad), lambda i: (0, 0)),
        ],
        out_specs=[
            pl.BlockSpec((TM, C_out_pad), lambda i: (i, 0)),
            pl.BlockSpec((1, 2, C_out_pad), lambda i: (i, 0, 0)),
        ],
        out_shape=[
            jax.ShapeDtypeStruct((R_pad, C_out_pad), jnp.bfloat16),      # bf16 intermediate y
            jax.ShapeDtypeStruct((n_tiles, 2, C_out_pad), jnp.float32),
        ],
        scratch_shapes=[pltpu.VMEM((TM, C_out_pad), jnp.float32)],
        compiler_params=cparams,
    )(p, w)

    # ---- tiny global reduction: Chan's parallel-variance combine (training-mode, biased var) ----
    # TODO(synk): running_mean / running_var state updates not modeled (forward output unaffected).
    cnts = jnp.minimum(TM, R - TM * jnp.arange(n_tiles)).astype(jnp.float32)[:, None]
    sums = stats[:, 0, :]                                   # (n_tiles, C_out_pad)
    m2s = stats[:, 1, :]
    total = float(R)
    mean = jnp.sum(sums, axis=0) / total
    mu_i = sums / cnts
    var = (jnp.sum(m2s, axis=0) + jnp.sum(cnts * (mu_i - mean) ** 2, axis=0)) / total
    inv_std = jax.lax.rsqrt(var + eps)
    gamma_p = jnp.pad(gamma.astype(jnp.float32), (0, C_out_pad - C_out))  # pad with 0 -> padded ch stay 0
    beta_p = jnp.pad(beta.astype(jnp.float32), (0, C_out_pad - C_out))
    scale = (gamma_p * inv_std).reshape(1, C_out_pad)
    shift = (beta_p - mean * gamma_p * inv_std).reshape(1, C_out_pad)

    # ---- pass 2: normalize + ReLU6 over big lane-dense row tiles ----
    z = pl.pallas_call(
        _bn_relu6_kernel,
        grid=(n_tiles,),
        in_specs=[
            pl.BlockSpec((TM, C_out_pad), lambda i: (i, 0)),
            pl.BlockSpec((1, C_out_pad), lambda i: (0, 0)),
            pl.BlockSpec((1, C_out_pad), lambda i: (0, 0)),
        ],
        out_specs=pl.BlockSpec((TM, C_out_pad), lambda i: (i, 0)),
        out_shape=jax.ShapeDtypeStruct((R_pad, C_out_pad), jnp.float32),
        compiler_params=cparams,
    )(y, scale, shift)

    # ---- framework-boundary layout only: slice padding, back to NCHW ----
    # TODO(synk): if the consumer accepts NHWC, return the lane-dense slab directly and skip the
    # transpose (it is an extra HBM round trip of the output).
    z = z[:R].reshape(N, H, W, C_out_pad)[..., :C_out]
    return jnp.transpose(z, (0, 3, 1, 2))


def conv_block_reference(x_nchw, weight, bias, gamma, beta, eps=1e-5):
    """Pure-JAX f32 reference of the PyTorch forward (training-mode BN)."""
    x = jnp.transpose(x_nchw, (0, 2, 3, 1)).astype(jnp.float32)
    xpad = jnp.pad(x, ((0, 0), (1, 1), (1, 1), (0, 0)), mode="reflect")
    w_hwio = jnp.transpose(weight, (2, 3, 1, 0)).astype(jnp.float32)
    y = jax.lax.conv_general_dilated(
        xpad, w_hwio, window_strides=(1, 1), padding="VALID",
        dimension_numbers=("NHWC", "HWIO", "NHWC"),
    ) + bias.reshape(1, 1, 1, -1)
    mean = jnp.mean(y, axis=(0, 1, 2), keepdims=True)
    var = jnp.mean((y - mean) ** 2, axis=(0, 1, 2), keepdims=True)
    z = (y - mean) * jax.lax.rsqrt(var + eps) * gamma.reshape(1, 1, 1, -1) \
        + beta.reshape(1, 1, 1, -1)
    z = jnp.clip(z, 0.0, 6.0)
    return jnp.transpose(z, (0, 3, 1, 2))


if __name__ == "__main__":
    # Small deterministic example consistent with Conv_block(input_channels=4, output_channels=8)
    N, C_in, C_out, H, W = 2, 4, 8, 16, 16
    key = jax.random.PRNGKey(0)
    kx, kw, kb = jax.random.split(key, 3)

    x = jax.random.normal(kx, (N, C_in, H, W), dtype=jnp.float32)
    fan_in = C_in * 9
    weight = jax.random.normal(kw, (C_out, C_in, 3, 3), dtype=jnp.float32) / jnp.sqrt(fan_in)
    bias = 0.1 * jax.random.normal(kb, (C_out,), dtype=jnp.float32)
    gamma = jnp.ones((C_out,), dtype=jnp.float32)   # BatchNorm2d default init
    beta = jnp.zeros((C_out,), dtype=jnp.float32)

    out = jax.block_until_ready(conv_block_forward(x, weight, bias, gamma, beta))
    ref = jax.block_until_ready(conv_block_reference(x, weight, bias, gamma, beta))

    assert out.shape == (N, C_out, H, W)
    # Tolerance accounts for bf16 MXU operands + bf16 intermediate y vs the f32 reference.
    assert jnp.allclose(out, ref, atol=5e-2, rtol=5e-2), float(jnp.max(jnp.abs(out - ref)))

    print("KERNEL_OK")
</pallas_src>

<mosaic_0001>
module attributes {stable_mosaic.version = 11 : i64} {
  func.func @_conv_stats_kernel(%arg0: i32, %arg1: memref<256x128xbf16, #tpu.memory_space<vmem>>, %arg2: memref<128x128xbf16, #tpu.memory_space<vmem>>, %arg3: memref<256x128xbf16, #tpu.memory_space<vmem>>, %arg4: memref<1x2x128xf32, #tpu.memory_space<vmem>>, %arg5: memref<256x128xf32, #tpu.memory_space<vmem>>) attributes {dimension_semantics = [#tpu.dimension_semantics<parallel>], iteration_bounds = array<i64: 2>, scalar_prefetch = 0 : i64, scratch_operands = 1 : i64, tpu.core_type = #tpu.core_type<tc>, window_params = [{transform_indices = @transform_0, window_bounds = array<i64: 256, 128>}, {pipeline_mode = #tpu.pipeline_mode<synchronous>, transform_indices = @transform_1, window_bounds = array<i64: 128, 128>}, {transform_indices = @transform_2, window_bounds = array<i64: 256, 128>}, {transform_indices = @transform_3, window_bounds = array<i64: 1, 2, 128>}]} {
    %c0 = arith.constant 0 : index
    %c0_0 = arith.constant 0 : index
    %0 = vector.load %arg1[%c0, %c0_0] : memref<256x128xbf16, #tpu.memory_space<vmem>>, vector<256x128xbf16>
    %c0_1 = arith.constant 0 : index
    %c0_2 = arith.constant 0 : index
    %1 = vector.load %arg2[%c0_1, %c0_2] : memref<128x128xbf16, #tpu.memory_space<vmem>>, vector<128x128xbf16>
    %cst = arith.constant dense<0.000000e+00> : vector<256x128xf32>
    %2 = tpu.matmul %0, %1, %cst {dimension_numbers = #tpu.dot_dimension_numbers<[1], [0], [0], [1], [0, 0, 1, 1], [], []>} : vector<256x128xbf16>, vector<128x128xbf16>, vector<256x128xf32> -> vector<256x128xf32>
    %c0_3 = arith.constant 0 : index
    %c0_4 = arith.constant 0 : index
    %3 = vector.load %arg5[%c0_3, %c0_4] : memref<256x128xf32, #tpu.memory_space<vmem>>, vector<256x128xf32>
    tpu.vector_store %arg5[%c0_3, %c0_4], %2 {strides = array<i32>} : memref<256x128xf32, #tpu.memory_space<vmem>>, vector<256x128xf32>,
    %c0_5 = arith.constant 0 : index
    %c0_6 = arith.constant 0 : index
    %4 = vector.load %arg5[%c0_5, %c0_6] : memref<256x128xf32, #tpu.memory_space<vmem>>, vector<256x128xf32>
    %5 = arith.truncf %4 : vector<256x128xf32> to vector<256x128xbf16>
    %c0_7 = arith.constant 0 : index
    %c0_8 = arith.constant 0 : index
    %6 = vector.load %arg3[%c0_7, %c0_8] : memref<256x128xbf16, #tpu.memory_space<vmem>>, vector<256x128xbf16>
    tpu.vector_store %arg3[%c0_7, %c0_8], %5 {strides = array<i32>} : memref<256x128xbf16, #tpu.memory_space<vmem>>, vector<256x128xbf16>,
    %c256_i32 = arith.constant 256 : i32
    %7 = arith.muli %arg0, %c256_i32 : i32
    %c512_i32 = arith.constant 512 : i32
    %8 = arith.subi %c512_i32, %7 : i32
    %c256_i32_9 = arith.constant 256 : i32
    %9 = arith.minsi %c256_i32_9, %8 : i32
    %10 = tpu.iota {dimensions = array<i32: 0>} : vector<256x1xi32>
    %11 = vector.broadcast %9 : i32 to vector<256x1xi32>
    %12 = arith.cmpi slt, %10, %11 : vector<256x1xi32>
    %13 = arith.extui %12 : vector<256x1xi1> to vector<256x1xi32>
    %14 = arith.sitofp %13 : vector<256x1xi32> to vector<256x1xf32>
    %c0_10 = arith.constant 0 : index
    %c0_11 = arith.constant 0 : index
    %15 = vector.load %arg5[%c0_10, %c0_11] : memref<256x128xf32, #tpu.memory_space<vmem>>, vector<256x128xf32>
    %16 = vector.broadcast %14 : vector<256x1xf32> to vector<256x128xf32>
    %17 = arith.mulf %15, %16 : vector<256x128xf32>
    %cst_12 = arith.constant dense<0.000000e+00> : vector<128xf32>
    %18 = vector.multi_reduction <add>, %17, %cst_12 [0] : vector<256x128xf32> to vector<128xf32>
    %19 = vector.shape_cast %18 : vector<128xf32> to vector<1x128xf32>
    %20 = arith.sitofp %9 : i32 to f32
    %21 = vector.broadcast %20 : f32 to vector<1x128xf32>
    %22 = arith.divf %19, %21 : vector<1x128xf32>
    %c0_13 = arith.constant 0 : index
    %c0_14 = arith.constant 0 : index
    %23 = vector.load %arg5[%c0_13, %c0_14] : memref<256x128xf32, #tpu.memory_space<vmem>>, vector<256x128xf32>
    %24 = vector.broadcast %22 : vector<1x128xf32> to vector<256x128xf32>
    %25 = arith.subf %23, %24 : vector<256x128xf32>
    %26 = vector.broadcast %14 : vector<256x1xf32> to vector<256x128xf32>
    %27 = arith.mulf %25, %26 : vector<256x128xf32>
    %28 = arith.mulf %27, %27 : vector<256x128xf32>
    %cst_15 = arith.constant dense<0.000000e+00> : vector<128xf32>
    %29 = vector.multi_reduction <add>, %28, %cst_15 [0] : vector<256x128xf32> to vector<128xf32>
    %30 = vector.shape_cast %29 : vector<128xf32> to vector<1x128xf32>
    %31 = tpu.concatenate %19, %30 in 0 : vector<1x128xf32>, vector<1x128xf32> -> vector<2x128xf32>
    %c0_16 = arith.constant 0 : index
    %c0_17 = arith.constant 0 : index
    %c0_18 = arith.constant 0 : index
    %32 = vector.load %arg4[%c0_16, %c0_17, %c0_18] : memref<1x2x128xf32, #tpu.memory_space<vmem>>, vector<1x2x128xf32>
    %33 = vector.shape_cast %32 : vector<1x2x128xf32> to vector<2x128xf32>
    %34 = vector.shape_cast %31 : vector<2x128xf32> to vector<1x2x128xf32>
    tpu.vector_store %arg4[%c0_16, %c0_17, %c0_18], %34 {strides = array<i32>} : memref<1x2x128xf32, #tpu.memory_space<vmem>>, vector<1x2x128xf32>,
    return
  }
  func.func @transform_0(%arg0: i32) -> (i32, i32) {
    %c0_i32 = arith.constant 0 : i32
    %c0_i32_0 = arith.constant 0 : i32
    return %arg0, %c0_i32 : i32, i32
  }
  func.func @transform_1(%arg0: i32) -> (i32, i32) {
    %c0_i32 = arith.constant 0 : i32
    %c0_i32_0 = arith.constant 0 : i32
    %c0_i32_1 = arith.constant 0 : i32
    return %c0_i32, %c0_i32_0 : i32, i32
  }
  func.func @transform_2(%arg0: i32) -> (i32, i32) {
    %c0_i32 = arith.constant 0 : i32
    %c0_i32_0 = arith.constant 0 : i32
    return %arg0, %c0_i32 : i32, i32
  }
  func.func @transform_3(%arg0: i32) -> (i32, i32, i32) {
    %c0_i32 = arith.constant 0 : i32
    %c0_i32_0 = arith.constant 0 : i32
    %c0_i32_1 = arith.constant 0 : i32
    return %arg0, %c0_i32, %c0_i32_0 : i32, i32, i32
  }
}

module attributes {stable_mosaic.version = 11 : i64} {
  func.func @_bn_relu6_kernel(%arg0: i32, %arg1: memref<256x128xbf16, #tpu.memory_space<vmem>>, %arg2: memref<1x128xf32, #tpu.memory_space<vmem>>, %arg3: memref<1x128xf32, #tpu.memory_space<vmem>>, %arg4: memref<256x128xf32, #tpu.memory_space<vmem>>) attributes {dimension_semantics = [#tpu.dimension_semantics<parallel>], iteration_bounds = array<i64: 2>, scalar_prefetch = 0 : i64, scratch_operands = 0 : i64, tpu.core_type = #tpu.core_type<tc>, window_params = [{transform_indices = @transform_0, window_bounds = array<i64: 256, 128>}, {pipeline_mode = #tpu.pipeline_mode<synchronous>, transform_indices = @transform_1, window_bounds = array<i64: 1, 128>}, {pipeline_mode = #tpu.pipeline_mode<synchronous>, transform_indices = @transform_2, window_bounds = array<i64: 1, 128>}, {transform_indices = @transform_3, window_bounds = array<i64: 256, 128>}]} {
    %c0 = arith.constant 0 : index
    %c0_0 = arith.constant 0 : index
    %0 = vector.load %arg1[%c0, %c0_0] : memref<256x128xbf16, #tpu.memory_space<vmem>>, vector<256x128xbf16>
    %1 = arith.extf %0 : vector<256x128xbf16> to vector<256x128xf32>
    %c0_1 = arith.constant 0 : index
    %c0_2 = arith.constant 0 : index
    %2 = vector.load %arg2[%c0_1, %c0_2] : memref<1x128xf32, #tpu.memory_space<vmem>>, vector<1x128xf32>
    %3 = vector.broadcast %2 : vector<1x128xf32> to vector<256x128xf32>
    %4 = arith.mulf %1, %3 : vector<256x128xf32>
    %c0_3 = arith.constant 0 : index
    %c0_4 = arith.constant 0 : index
    %5 = vector.load %arg3[%c0_3, %c0_4] : memref<1x128xf32, #tpu.memory_space<vmem>>, vector<1x128xf32>
    %6 = vector.broadcast %5 : vector<1x128xf32> to vector<256x128xf32>
    %7 = arith.addf %4, %6 : vector<256x128xf32>
    %cst = arith.constant 0.000000e+00 : f32
    %cst_5 = arith.constant 6.000000e+00 : f32
    %8 = vector.broadcast %cst : f32 to vector<256x128xf32>
    %9 = arith.maximumf %8, %7 : vector<256x128xf32>
    %10 = vector.broadcast %cst_5 : f32 to vector<256x128xf32>
    %11 = arith.minimumf %10, %9 : vector<256x128xf32>
    %c0_6 = arith.constant 0 : index
    %c0_7 = arith.constant 0 : index
    %12 = vector.load %arg4[%c0_6, %c0_7] : memref<256x128xf32, #tpu.memory_space<vmem>>, vector<256x128xf32>
    tpu.vector_store %arg4[%c0_6, %c0_7], %11 {strides = array<i32>} : memref<256x128xf32, #tpu.memory_space<vmem>>, vector<256x128xf32>,
    return
  }
  func.func @transform_0(%arg0: i32) -> (i32, i32) {
    %c0_i32 = arith.constant 0 : i32
    %c0_i32_0 = arith.constant 0 : i32
    return %arg0, %c0_i32 : i32, i32
  }
  func.func @transform_1(%arg0: i32) -> (i32, i32) {
    %c0_i32 = arith.constant 0 : i32
    %c0_i32_0 = arith.constant 0 : i32
    %c0_i32_1 = arith.constant 0 : i32
    return %c0_i32, %c0_i32_0 : i32, i32
  }
  func.func @transform_2(%arg0: i32) -> (i32, i32) {
    %c0_i32 = arith.constant 0 : i32
    %c0_i32_0 = arith.constant 0 : i32
    %c0_i32_1 = arith.constant 0 : i32
    return %c0_i32, %c0_i32_0 : i32, i32
  }
  func.func @transform_3(%arg0: i32) -> (i32, i32) {
    %c0_i32 = arith.constant 0 : i32
    %c0_i32_0 = arith.constant 0 : i32
    return %arg0, %c0_i32 : i32, i32
  }
}

</mosaic_0001>

<bundles_post_ra>
// kernel: conv_block_forward.3
= control target key start
LH: loop header
LB: loop body
LE: loop exit
PB: predicated region body
PF: predicated region fallthrough
CT: control target
= control target key end

     0   :  { %s590_s12 = smov 0   ;;  %s737_s0 = inlined_call_operand.vmem [shape: bf16[512,128], index: 0, kind: input, shape index: {}]   ;;  %s738_s1 = inlined_call_operand.vmem [shape: f32[1,128], index: 1, kind: input, shape index: {}]   ;;  %s739_s2 = inlined_call_operand.vmem [shape: f32[1,128], index: 2, kind: input, shape index: {}]   ;;  %s740_s3 = inlined_call_operand.vmem [shape: f32[512,128], index: 3, kind: output, shape index: {}]  }
   0x1 LB: > { %s462_s13 = sadd.s32 4294967295, %s568_s12   ;;  %p466_p0 = scmp.ge.s32.totalorder %s568_s12, 1  ;;  %s568_s12 = sphi %s590_s12, %s13_s12  }
   0x2   : > { %p138_p1 = scmp.lt.s32.totalorder %s568_s12, 3 }
   0x4   : > { %p139_p2 = pnand %p466_p0, %p138_p1 }
   0x5   : > { %s467_s14 = sshll.u32 (!%p139_p2), %s462_s13, 5 }
   0x6   : > { %142 = sbr.rel (%p139_p2) target bundleno = 63 (0x3f), region = 32  ;;  %p163_p3 = scmp.lt.s32.totalorder (!%p139_p2), %s467_s14, 63 }
   0xb   : > { %s742_s14 = smov (!%p163_p3, %s467_s14), 63  ;;  %v609_v0 = vld [vmem:[%s738_s1] ss:$0 sm:$0xff] }
   0xc   : > { %s468_s15 = sshll.u32 %s742_s14, 2  ;;  %v617_v5 = vld [vmem:[%s739_s2] ss:$0 sm:$0xff]  ;;  %s470_s23 = sshll.u32 %s742_s14, 3 }
   0xd   : > { %s604_s18 = scalar_lea.vmem %s737_s0, %s468_s15  ;;  %s640_s26 = scalar_lea.vmem %s740_s3, %s470_s23 }
   0xe   : > { %v474_v1 = vld [vmem:[%s604_s18] sm:$0xff]   ;;  %v537_v2 = vld [vmem:[%s604_s18 + $0x8] sm:$0xff]   ;;  %v538_v3 = vld [vmem:[%s604_s18 + $0x10] sm:$0xff]  }
   0xf   : > { %v475_v4 = vunpack.c.l.bf16 %v474_v1  ;;  %v476_v6 = vunpack.c.h.bf16 %v474_v1  ;;  %v479_v7 = vunpack.c.l.bf16 %v537_v2  ;;  %v480_v8 = vunpack.c.h.bf16 %v537_v2  ;;  %v539_v9 = vld [vmem:[%s604_s18 + $0x18] sm:$0xff]   ;;  %v540_v38 = vld [vmem:[%s604_s18 + $0x20] sm:$0xff]   ;;  %v541_v39 = vld [vmem:[%s604_s18 + $0x28] sm:$0xff]  }
  0x10   : > { %v483_v10 = vunpack.c.l.bf16 %v538_v3  ;;  %v484_v11 = vunpack.c.h.bf16 %v538_v3  ;;  %v487_v12 = vunpack.c.l.bf16 %v539_v9  ;;  %v488_v13 = vunpack.c.h.bf16 %v539_v9  ;;  %v542_v44 = vld [vmem:[%s604_s18 + $0x30] sm:$0xff]   ;;  %v543_v45 = vld [vmem:[%s604_s18 + $0x38] sm:$0xff]  }
  0x11   : > { %v242_v14 = vmul.f32 %v609_v0, %v475_v4  ;;  %v243_v15 = vmul.f32 %v609_v0, %v476_v6  ;;  %v244_v16 = vmul.f32 %v609_v0, %v479_v7  ;;  %v245_v17 = vmul.f32 %v609_v0, %v480_v8 }
  0x12   : > { %v246_v18 = vmul.f32 %v609_v0, %v483_v10  ;;  %v247_v19 = vmul.f32 %v609_v0, %v484_v11  ;;  %v248_v20 = vmul.f32 %v609_v0, %v487_v12  ;;  %v249_v21 = vmul.f32 %v609_v0, %v488_v13 }
  0x13   : > { %v278_v22 = vadd.f32 %v617_v5, %v242_v14  ;;  %v279_v23 = vadd.f32 %v617_v5, %v243_v15  ;;  %v280_v24 = vadd.f32 %v617_v5, %v244_v16  ;;  %v281_v25 = vadd.f32 %v617_v5, %v245_v17  ;;  %v544_v16 = vld [vmem:[%s604_s18 + $0x40] sm:$0xff]  }
  0x14   : > { %v282_v26 = vadd.f32 %v617_v5, %v246_v18  ;;  %v283_v27 = vadd.f32 %v617_v5, %v247_v19  ;;  %v284_v28 = vadd.f32 %v617_v5, %v248_v20  ;;  %v285_v29 = vadd.f32 %v617_v5, %v249_v21  ;;  %v545_v21 = vld [vmem:[%s604_s18 + $0x48] sm:$0xff]  }
  0x15   : > { %v310_v30 = vmax.f32 %v278_v22, 0.0  ;;  %v311_v31 = vmax.f32 %v279_v23, 0.0  ;;  %v312_v32 = vmax.f32 %v280_v24, 0.0  ;;  %v313_v33 = vmax.f32 %v281_v25, 0.0 }
  0x16   : > { %v314_v34 = vmax.f32 %v282_v26, 0.0  ;;  %v315_v35 = vmax.f32 %v283_v27, 0.0  ;;  %v316_v36 = vmax.f32 %v284_v28, 0.0  ;;  %v317_v37 = vmax.f32 %v285_v29, 0.0  ;;  %v546_v26 = vld [vmem:[%s604_s18 + $0x50] sm:$0xff]   ;;  %v547_v27 = vld [vmem:[%s604_s18 + $0x58] sm:$0xff]  }
  0x17   : > { %v342_v40 = vmin.f32 %v310_v30, 6.0  ;;  %v343_v41 = vmin.f32 %v311_v31, 6.0  ;;  %v344_v42 = vmin.f32 %v312_v32, 6.0  ;;  %v345_v43 = vmin.f32 %v313_v33, 6.0 }
  0x18   : > { %v346_v46 = vmin.f32 %v314_v34, 6.0  ;;  %v347_v47 = vmin.f32 %v315_v35, 6.0  ;;  %v348_v48 = vmin.f32 %v316_v36, 6.0  ;;  %v349_v49 = vmin.f32 %v317_v37, 6.0 }
  0x19   : > { %374 = vst [vmem:[%s640_s26] sm:$0xff] %v342_v40  ;;  %v491_v50 = vunpack.c.l.bf16 %v540_v38  ;;  %v492_v51 = vunpack.c.h.bf16 %v540_v38  ;;  %v495_v52 = vunpack.c.l.bf16 %v541_v39  ;;  %v496_v53 = vunpack.c.h.bf16 %v541_v39 }
  0x1a   : > { %375 = vst [vmem:[%s640_s26 + $0x8] sm:$0xff] %v343_v41  ;;  %v499_v54 = vunpack.c.l.bf16 %v542_v44  ;;  %v500_v55 = vunpack.c.h.bf16 %v542_v44  ;;  %v503_v56 = vunpack.c.l.bf16 %v543_v45  ;;  %v504_v57 = vunpack.c.h.bf16 %v543_v45 }
  0x1b   : > { %376 = vst [vmem:[%s640_s26 + $0x10] sm:$0xff] %v344_v42  ;;  %v250_v58 = vmul.f32 %v609_v0, %v491_v50  ;;  %v251_v59 = vmul.f32 %v609_v0, %v492_v51  ;;  %v252_v60 = vmul.f32 %v609_v0, %v495_v52  ;;  %v253_v61 = vmul.f32 %v609_v0, %v496_v53 }
  0x1c   : > { %377 = vst [vmem:[%s640_s26 + $0x18] sm:$0xff] %v345_v43  ;;  %v254_v62 = vmul.f32 %v609_v0, %v499_v54  ;;  %v255_v63 = vmul.f32 %v609_v0, %v500_v55  ;;  %v256_v1 = vmul.f32 %v609_v0, %v503_v56  ;;  %v257_v2 = vmul.f32 %v609_v0, %v504_v57 }
  0x1d   : > { %378 = vst [vmem:[%s640_s26 + $0x20] sm:$0xff] %v346_v46  ;;  %v286_v3 = vadd.f32 %v617_v5, %v250_v58  ;;  %v287_v4 = vadd.f32 %v617_v5, %v251_v59  ;;  %v288_v6 = vadd.f32 %v617_v5, %v252_v60  ;;  %v289_v7 = vadd.f32 %v617_v5, %v253_v61  ;;  %v548_v60 = vld [vmem:[%s604_s18 + $0x60] sm:$0xff]  }
  0x1e   : > { %379 = vst [vmem:[%s640_s26 + $0x28] sm:$0xff] %v347_v47  ;;  %v290_v8 = vadd.f32 %v617_v5, %v254_v62  ;;  %v291_v9 = vadd.f32 %v617_v5, %v255_v63  ;;  %v292_v10 = vadd.f32 %v617_v5, %v256_v1  ;;  %v293_v11 = vadd.f32 %v617_v5, %v257_v2  ;;  %v549_v2 = vld [vmem:[%s604_s18 + $0x68] sm:$0xff]  }
  0x1f   : > { %380 = vst [vmem:[%s640_s26 + $0x30] sm:$0xff] %v348_v48  ;;  %v318_v12 = vmax.f32 %v286_v3, 0.0  ;;  %v319_v13 = vmax.f32 %v287_v4, 0.0  ;;  %v320_v14 = vmax.f32 %v288_v6, 0.0  ;;  %v321_v15 = vmax.f32 %v289_v7, 0.0 }
  0x20   : > { %381 = vst [vmem:[%s640_s26 + $0x38] sm:$0xff] %v349_v49  ;;  %v322_v17 = vmax.f32 %v290_v8, 0.0  ;;  %v323_v18 = vmax.f32 %v291_v9, 0.0  ;;  %v324_v19 = vmax.f32 %v292_v10, 0.0  ;;  %v325_v20 = vmax.f32 %v293_v11, 0.0  ;;  %v550_v8 = vld [vmem:[%s604_s18 + $0x70] sm:$0xff]  }
  0x21   : > { %v350_v22 = vmin.f32 %v318_v12, 6.0  ;;  %v351_v23 = vmin.f32 %v319_v13, 6.0  ;;  %v352_v24 = vmin.f32 %v320_v14, 6.0  ;;  %v353_v25 = vmin.f32 %v321_v15, 6.0  ;;  %v551_v9 = vld [vmem:[%s604_s18 + $0x78] sm:$0xff]  }
  0x22   : > { %v354_v28 = vmin.f32 %v322_v17, 6.0  ;;  %v355_v29 = vmin.f32 %v323_v18, 6.0  ;;  %v356_v30 = vmin.f32 %v324_v19, 6.0  ;;  %v357_v31 = vmin.f32 %v325_v20, 6.0 }
  0x23   : > { %382 = vst [vmem:[%s640_s26 + $0x40] sm:$0xff] %v350_v22  ;;  %v507_v32 = vunpack.c.l.bf16 %v544_v16  ;;  %v508_v33 = vunpack.c.h.bf16 %v544_v16  ;;  %v511_v34 = vunpack.c.l.bf16 %v545_v21  ;;  %v512_v35 = vunpack.c.h.bf16 %v545_v21 }
  0x24   : > { %383 = vst [vmem:[%s640_s26 + $0x48] sm:$0xff] %v351_v23  ;;  %v515_v36 = vunpack.c.l.bf16 %v546_v26  ;;  %v516_v37 = vunpack.c.h.bf16 %v546_v26  ;;  %v519_v38 = vunpack.c.l.bf16 %v547_v27  ;;  %v520_v39 = vunpack.c.h.bf16 %v547_v27 }
  0x25   : > { %384 = vst [vmem:[%s640_s26 + $0x50] sm:$0xff] %v352_v24  ;;  %v258_v40 = vmul.f32 %v609_v0, %v507_v32  ;;  %v259_v41 = vmul.f32 %v609_v0, %v508_v33  ;;  %v260_v42 = vmul.f32 %v609_v0, %v511_v34  ;;  %v261_v43 = vmul.f32 %v609_v0, %v512_v35 }
  0x26   : > { %385 = vst [vmem:[%s640_s26 + $0x58] sm:$0xff] %v353_v25  ;;  %v262_v44 = vmul.f32 %v609_v0, %v515_v36  ;;  %v263_v45 = vmul.f32 %v609_v0, %v516_v37  ;;  %v264_v46 = vmul.f32 %v609_v0, %v519_v38  ;;  %v265_v47 = vmul.f32 %v609_v0, %v520_v39 }
  0x27   : > { %386 = vst [vmem:[%s640_s26 + $0x60] sm:$0xff] %v354_v28  ;;  %v294_v48 = vadd.f32 %v617_v5, %v258_v40  ;;  %v295_v49 = vadd.f32 %v617_v5, %v259_v41  ;;  %v296_v50 = vadd.f32 %v617_v5, %v260_v42  ;;  %v297_v51 = vadd.f32 %v617_v5, %v261_v43 }
  0x28   : > { %387 = vst [vmem:[%s640_s26 + $0x68] sm:$0xff] %v355_v29  ;;  %v298_v52 = vadd.f32 %v617_v5, %v262_v44  ;;  %v299_v53 = vadd.f32 %v617_v5, %v263_v45  ;;  %v300_v54 = vadd.f32 %v617_v5, %v264_v46  ;;  %v301_v55 = vadd.f32 %v617_v5, %v265_v47 }
  0x29   : > { %388 = vst [vmem:[%s640_s26 + $0x70] sm:$0xff] %v356_v30  ;;  %v326_v56 = vmax.f32 %v294_v48, 0.0  ;;  %v327_v57 = vmax.f32 %v295_v49, 0.0  ;;  %v328_v58 = vmax.f32 %v296_v50, 0.0  ;;  %v329_v59 = vmax.f32 %v297_v51, 0.0 }
  0x2a   : > { %389 = vst [vmem:[%s640_s26 + $0x78] sm:$0xff] %v357_v31  ;;  %v330_v61 = vmax.f32 %v298_v52, 0.0  ;;  %v331_v62 = vmax.f32 %v299_v53, 0.0  ;;  %v332_v63 = vmax.f32 %v300_v54, 0.0  ;;  %v333_v1 = vmax.f32 %v301_v55, 0.0 }
  0x2b   : > { %v358_v3 = vmin.f32 %v326_v56, 6.0  ;;  %v359_v4 = vmin.f32 %v327_v57, 6.0  ;;  %v360_v6 = vmin.f32 %v328_v58, 6.0  ;;  %v361_v7 = vmin.f32 %v329_v59, 6.0 }
  0x2c   : > { %v362_v10 = vmin.f32 %v330_v61, 6.0  ;;  %v363_v11 = vmin.f32 %v331_v62, 6.0  ;;  %v364_v12 = vmin.f32 %v332_v63, 6.0  ;;  %v365_v13 = vmin.f32 %v333_v1, 6.0 }
  0x2d   : > { %390 = vst [vmem:[%s640_s26 + $0x80] sm:$0xff] %v358_v3  ;;  %v523_v14 = vunpack.c.l.bf16 %v548_v60  ;;  %v524_v15 = vunpack.c.h.bf16 %v548_v60  ;;  %v527_v16 = vunpack.c.l.bf16 %v549_v2  ;;  %v528_v17 = vunpack.c.h.bf16 %v549_v2 }
  0x2e   : > { %391 = vst [vmem:[%s640_s26 + $0x88] sm:$0xff] %v359_v4  ;;  %v531_v18 = vunpack.c.l.bf16 %v550_v8  ;;  %v532_v19 = vunpack.c.h.bf16 %v550_v8  ;;  %v535_v20 = vunpack.c.l.bf16 %v551_v9  ;;  %v536_v21 = vunpack.c.h.bf16 %v551_v9 }
  0x2f   : > { %392 = vst [vmem:[%s640_s26 + $0x90] sm:$0xff] %v360_v6  ;;  %v266_v22 = vmul.f32 %v609_v0, %v523_v14  ;;  %v267_v23 = vmul.f32 %v609_v0, %v524_v15  ;;  %v268_v24 = vmul.f32 %v609_v0, %v527_v16  ;;  %v269_v25 = vmul.f32 %v609_v0, %v528_v17 }
  0x30   : > { %393 = vst [vmem:[%s640_s26 + $0x98] sm:$0xff] %v361_v7  ;;  %v270_v26 = vmul.f32 %v609_v0, %v531_v18  ;;  %v271_v27 = vmul.f32 %v609_v0, %v532_v19  ;;  %v272_v28 = vmul.f32 %v609_v0, %v535_v20  ;;  %v273_v29 = vmul.f32 %v609_v0, %v536_v21 }
  0x31   : > { %394 = vst [vmem:[%s640_s26 + $0xa0] sm:$0xff] %v362_v10  ;;  %v302_v30 = vadd.f32 %v617_v5, %v266_v22  ;;  %v303_v31 = vadd.f32 %v617_v5, %v267_v23  ;;  %v304_v32 = vadd.f32 %v617_v5, %v268_v24  ;;  %v305_v33 = vadd.f32 %v617_v5, %v269_v25 }
  0x32   : > { %395 = vst [vmem:[%s640_s26 + $0xa8] sm:$0xff] %v363_v11  ;;  %v306_v34 = vadd.f32 %v617_v5, %v270_v26  ;;  %v307_v35 = vadd.f32 %v617_v5, %v271_v27  ;;  %v308_v36 = vadd.f32 %v617_v5, %v272_v28  ;;  %v309_v0 = vadd.f32 %v617_v5, %v273_v29 }
  0x33   : > { %396 = vst [vmem:[%s640_s26 + $0xb0] sm:$0xff] %v364_v12  ;;  %v334_v37 = vmax.f32 %v302_v30, 0.0  ;;  %v335_v38 = vmax.f32 %v303_v31, 0.0  ;;  %v336_v39 = vmax.f32 %v304_v32, 0.0  ;;  %v337_v40 = vmax.f32 %v305_v33, 0.0 }
  0x34   : > { %397 = vst [vmem:[%s640_s26 + $0xb8] sm:$0xff] %v365_v13  ;;  %v338_v41 = vmax.f32 %v306_v34, 0.0  ;;  %v339_v42 = vmax.f32 %v307_v35, 0.0  ;;  %v340_v46 = vmax.f32 %v308_v36, 0.0  ;;  %v341_v47 = vmax.f32 %v309_v0, 0.0 }
  0x35   : > { %v366_v43 = vmin.f32 %v334_v37, 6.0  ;;  %v367_v44 = vmin.f32 %v335_v38, 6.0  ;;  %v368_v45 = vmin.f32 %v336_v39, 6.0  ;;  %v369_v5 = vmin.f32 %v337_v40, 6.0 }
  0x36   : > { %v370_v48 = vmin.f32 %v338_v41, 6.0  ;;  %v371_v49 = vmin.f32 %v339_v42, 6.0  ;;  %v372_v50 = vmin.f32 %v340_v46, 6.0  ;;  %v373_v51 = vmin.f32 %v341_v47, 6.0 }
  0x37   : > { %398 = vst [vmem:[%s640_s26 + $0xc0] sm:$0xff] %v366_v43 }
  0x38   : > { %399 = vst [vmem:[%s640_s26 + $0xc8] sm:$0xff] %v367_v44 }
  0x39   : > { %400 = vst [vmem:[%s640_s26 + $0xd0] sm:$0xff] %v368_v45 }
  0x3a   : > { %401 = vst [vmem:[%s640_s26 + $0xd8] sm:$0xff] %v369_v5 }
  0x3b   : > { %402 = vst [vmem:[%s640_s26 + $0xe0] sm:$0xff] %v370_v48 }
  0x3c   : > { %403 = vst [vmem:[%s640_s26 + $0xe8] sm:$0xff] %v371_v49 }
  0x3d   : > { %404 = vst [vmem:[%s640_s26 + $0xf0] sm:$0xff] %v372_v50 }
  0x3e   : > { %405 = vst [vmem:[%s640_s26 + $0xf8] sm:$0xff] %v373_v51 }
  0x3f PF: > { %s13_s12 = sadd.s32 1, %s568_s12  }
  0x40   : > { %p10_p4 = scmp.ge.s32.totalorder %s13_s12, 4  }
  0x42   :  { %12 = sbr.rel (!%p10_p4) target bundleno = 1 (0x1), region = 62 }

// kernel: conv_block_forward.2
= control target key start
LH: loop header
LB: loop body
LE: loop exit
PB: predicated region body
PF: predicated region fallthrough
CT: control target
= control target key end

     0   :  { %s1393_s12 = smov 0   ;;  %s1916_s0 = inlined_call_operand.vmem [shape: bf16[512,128], index: 0, kind: input, shape index: {}]   ;;  %s1917_s1 = inlined_call_operand.vmem [shape: bf16[128,128], index: 1, kind: input, shape index: {}]   ;;  %s1918_s2 = inlined_call_operand.vmem [shape: bf16[512,128], index: 2, kind: output, shape index: {0}]   ;;  %s1919_s3 = inlined_call_operand.vmem [shape: f32[2,2,128], index: 3, kind: output, shape index: {1}]  }
   0x1 LB: > { %s1399_s13 = sadd.s32 4294967295, %s1370_s12   ;;  %p1073_p0 = scmp.ge.s32.totalorder %s1370_s12, 1  ;;  %s1370_s12 = sphi %s1393_s12, %s14_s12  }
   0x2   : > { %p141_p1 = scmp.lt.s32.totalorder %s1370_s12, 3 }
   0x4   : > { %p142_p2 = pnand %p1073_p0, %p141_p1 }
   0x6   : > { %145 = sbr.rel (%p142_p2) target bundleno = 373 (0x175), region = 28 }
   0xb   : > { %v1233_v0 = vld [vmem:[%s1917_s1 + $0x38] sm:$0xff]  ;;  %v1232_v1 = vld [vmem:[%s1917_s1 + $0x30] sm:$0xff]  ;;  %v1231_v2 = vld [vmem:[%s1917_s1 + $0x28] sm:$0xff]  ;;  %s1074_s22 = sshll.u32 %s1399_s13, 5  ;;  %s1175_s11 = sshll.u32 %s1399_s13, 8  ;;  %v598_v44 = vlaneseq  ;;  %v1372_v58 = vmov 0.0  }
   0xc   : > { %377 = vmatpush.bf16.msra.mxu0 %v1233_v0  ;;  %1329 = vmatpush.bf16.msra.mxu1 %v1233_v0  ;;  %v1230_v3 = vld [vmem:[%s1917_s1 + $0x20] sm:$0xff]  ;;  %v1229_v4 = vld [vmem:[%s1917_s1 + $0x18] sm:$0xff]  ;;  %p170_p3 = scmp.lt.s32.totalorder %s1074_s22, 63  ;;  %v1228_v5 = vld [vmem:[%s1917_s1 + $0x10] sm:$0xff]  ;;  %s595_s14 = ssub.s32 512, %s1175_s11 }
   0xd   : > { %1330 = vmatpush.bf16.msra.mxu2 %v1233_v0  ;;  %1331 = vmatpush.bf16.msra.mxu3 %v1233_v0  ;;  %v1227_v6 = vld [vmem:[%s1917_s1 + $0x8] sm:$0xff]  ;;  %v1226_v7 = vld [vmem:[%s1917_s1] sm:$0xff]  ;;  %p596_p4 = scmp.lt.s32.totalorder %s595_s14, 256  ;;  %v1508_v45 = vshrl.u32 %v598_v44, 7  ;;  %p181_p5 = scmp.lt.s32.totalorder %s1399_s13, 1 }
   0xe   : > { %s1978_s22 = smov (!%p170_p3, %s1074_s22), 63 }
   0xf   : > { %s1075_s29 = sshll.u32 %s1978_s22, 2  ;;  %s1980_s14 = smov (!%p596_p4, %s595_s14), 256  ;;  %v600_v50 = vadd.s32 8, %v1508_v45  ;;  %v601_v53 = vadd.s32 16, %v1508_v45  ;;  %v602_v55 = vadd.s32 24, %v1508_v45  ;;  %v603_v56 = vadd.s32 32, %v1508_v45 }
  0x10   : > { %378 = vmatpush.bf16.msra.mxu0 %v1232_v1  ;;  %1332 = vmatpush.bf16.msra.mxu1 %v1232_v1  ;;  %s1436_s7 = scalar_lea.vmem %s1916_s0, %s1075_s29  ;;  %s1465_s10 = scalar_lea.vmem %s1918_s2, %s1075_s29  ;;  %v1528_v54 = vstv %s1980_s14  ;;  %v604_v63 = vadd.s32 40, %v1508_v45 }
  0x11   : > { %1333 = vmatpush.bf16.msra.mxu2 %v1232_v1  ;;  %1334 = vmatpush.bf16.msra.mxu3 %v1232_v1  ;;  %v1210_v8 = vld [vmem:[%s1436_s7] sm:$0xff]  ;;  %v1211_v12 = vld [vmem:[%s1436_s7 + $0x8] sm:$0xff]  ;;  %v1212_v16 = vld [vmem:[%s1436_s7 + $0x10] sm:$0xff]  ;;  %vm633_vm0 = vcmp.lt.s32.totalorder %v600_v50, %v1528_v54  ;;  %vm632_vm1 = vcmp.lt.s32.totalorder %v1508_v45, %v1528_v54  ;;  %vm634_vm2 = vcmp.lt.s32.totalorder %v601_v53, %v1528_v54  ;;  %s829_s15 = scvt.s32.f32 %s1980_s14  ;;  %s1982_s13 = smov (!%p181_p5, %s1399_s13), 1 }
  0x12   : > { %v1214_v9 = vld [vmem:[%s1436_s7 + $0x20] sm:$0xff]  ;;  %v1215_v13 = vld [vmem:[%s1436_s7 + $0x28] sm:$0xff]  ;;  %v1216_v17 = vld [vmem:[%s1436_s7 + $0x30] sm:$0xff]  ;;  %v1540_v59 = vsel %vm633_vm0, 1.0, %v1372_v58  ;;  %vm635_vm3 = vcmp.lt.s32.totalorder %v602_v55, %v1528_v54  ;;  %vm636_vm4 = vcmp.lt.s32.totalorder %v603_v56, %v1528_v54  ;;  %vm637_vm5 = vcmp.lt.s32.totalorder %v604_v63, %v1528_v54  ;;  %s1078_s16 = sshll.u32 %s1982_s13, 1 }
  0x13   : > { %v1218_v10 = vld [vmem:[%s1436_s7 + $0x40] sm:$0xff]  ;;  %v1219_v14 = vld [vmem:[%s1436_s7 + $0x48] sm:$0xff]  ;;  %v1220_v18 = vld [vmem:[%s1436_s7 + $0x50] sm:$0xff]  ;;  %v611_v55 = vadd.s32 96, %v1508_v45  ;;  %s184_s19 = scalar_lea.vmem %s1919_s3, %s1078_s16 }
  0x14   : > { %379 = vmatpush.bf16.msra.mxu0 %v1231_v2  ;;  %1335 = vmatpush.bf16.msra.mxu1 %v1231_v2  ;;  %v1222_v11 = vld [vmem:[%s1436_s7 + $0x60] sm:$0xff]  ;;  %v1223_v15 = vld [vmem:[%s1436_s7 + $0x68] sm:$0xff]  ;;  %v1224_v19 = vld [vmem:[%s1436_s7 + $0x70] sm:$0xff] }
  0x15   : > { %1336 = vmatpush.bf16.msra.mxu2 %v1231_v2  ;;  %1337 = vmatpush.bf16.msra.mxu3 %v1231_v2  ;;  %v1213_v20 = vld [vmem:[%s1436_s7 + $0x18] sm:$0xff]  ;;  %v1555_v2 = vsel %vm632_vm1, 1.0, %v1372_v58  ;;  %vm644_vm12 = vcmp.lt.s32.totalorder %v611_v55, %v1528_v54 }
  0x16   : > { %v1217_v21 = vld [vmem:[%s1436_s7 + $0x38] sm:$0xff] }
  0x17   : > { %v1221_v22 = vld [vmem:[%s1436_s7 + $0x58] sm:$0xff] }
  0x18   : > { %380 = vmatpush.bf16.msra.mxu0 %v1230_v3  ;;  %1338 = vmatpush.bf16.msra.mxu1 %v1230_v3  ;;  %v1225_v23 = vld [vmem:[%s1436_s7 + $0x78] sm:$0xff] }
  0x19   : > { %1339 = vmatpush.bf16.msra.mxu2 %v1230_v3  ;;  %1340 = vmatpush.bf16.msra.mxu3 %v1230_v3  ;;  %v1558_v3 = vsel %vm634_vm2, 1.0, %v1372_v58 }
  0x1c   : > { %381 = vmatpush.bf16.msra.mxu0 %v1229_v4  ;;  %1341 = vmatpush.bf16.msra.mxu1 %v1229_v4 }
  0x1d   : > { %1342 = vmatpush.bf16.msra.mxu2 %v1229_v4  ;;  %1343 = vmatpush.bf16.msra.mxu3 %v1229_v4 }
  0x20   : > { %382 = vmatpush.bf16.msra.mxu0 %v1228_v5  ;;  %1344 = vmatpush.bf16.msra.mxu1 %v1228_v5 }
  0x21   : > { %1345 = vmatpush.bf16.msra.mxu2 %v1228_v5  ;;  %1346 = vmatpush.bf16.msra.mxu3 %v1228_v5  ;;  %v605_v5 = vadd.s32 48, %v1508_v45 }
  0x23   : > { %vm638_vm6 = vcmp.lt.s32.totalorder %v605_v5, %v1528_v54 }
  0x24   : > { %383 = vmatpush.bf16.msra.mxu0 %v1227_v6  ;;  %1347 = vmatpush.bf16.msra.mxu1 %v1227_v6 }
  0x25   : > { %1348 = vmatpush.bf16.msra.mxu2 %v1227_v6  ;;  %1349 = vmatpush.bf16.msra.mxu3 %v1227_v6  ;;  %v1566_v6 = vsel %vm635_vm3, 1.0, %v1372_v58 }
  0x28   : > { %384 = vmatpush.bf16.msra.mxu0 %v1226_v7  ;;  %1350 = vmatpush.bf16.msra.mxu1 %v1226_v7 }
  0x29   : > { %1351 = vmatpush.bf16.msra.mxu2 %v1226_v7  ;;  %1352 = vmatpush.bf16.msra.mxu3 %v1226_v7 }
  0x2b   : > { %385 = vmatmul.bf16.vlgmr.msra.gmra.mxu0 %v1210_v8  ;;  %405 = vmatmul.bf16.vlgmr.msra.gmra.mxu1 %v1214_v9  ;;  %v1575_v9 = vsel %vm636_vm4, 1.0, %v1372_v58 }
  0x2c   : > { %425 = vmatmul.bf16.vlgmr.msra.gmra.mxu2 %v1218_v10  ;;  %445 = vmatmul.bf16.vlgmr.msra.gmra.mxu3 %v1222_v11 }
  0x3b   : > { %390 = vmatmul.bf16.gmra.mxu0 %v1211_v12  ;;  %410 = vmatmul.bf16.gmra.mxu1 %v1215_v13  ;;  %v606_v12 = vadd.s32 56, %v1508_v45 }
  0x3c   : > { %430 = vmatmul.bf16.gmra.mxu2 %v1219_v14  ;;  %450 = vmatmul.bf16.gmra.mxu3 %v1223_v15  ;;  %v1584_v14 = vsel %vm637_vm5, 1.0, %v1372_v58 }
  0x3d   : > { %vm639_vm7 = vcmp.lt.s32.totalorder %v606_v12, %v1528_v54 }
  0x3e   : > { %v1613_v44 = vsel %vm639_vm7, 1.0, %v1372_v58 }
  0x4b   : > { %395 = vmatmul.bf16.gmra.mxu0 %v1212_v16  ;;  %415 = vmatmul.bf16.gmra.mxu1 %v1216_v17 }
  0x4c   : > { %435 = vmatmul.bf16.gmra.mxu2 %v1220_v18  ;;  %455 = vmatmul.bf16.gmra.mxu3 %v1224_v19  ;;  %v607_v18 = vadd.s32 64, %v1508_v45 }
  0x4e   : > { %vm640_vm8 = vcmp.lt.s32.totalorder %v607_v18, %v1528_v54 }
  0x4f   : > { %v1620_v53 = vsel %vm640_vm8, 1.0, %v1372_v58 }
  0x5b   : > { %400 = vmatmul.bf16.gmra.mxu0 %v1213_v20  ;;  %420 = vmatmul.bf16.gmra.mxu1 %v1217_v21 }
  0x5c   : > { %440 = vmatmul.bf16.gmra.mxu2 %v1221_v22  ;;  %460 = vmatmul.bf16.gmra.mxu3 %v1225_v23  ;;  %v1598_v22 = vsel %vm638_vm6, 1.0, %v1372_v58 }
  0xa8   : > { %v1454_v24 = vpop.f32.mrf.mxu0  ;;  %v1456_v25 = vpop.f32.mrf.mxu1 }
  0xa9   : > { %v760_v7 = vmul.f32 %v1555_v2, %v1454_v24 }
  0xaf   : > { %v1458_v26 = vpop.f32.mrf.mxu2  ;;  %v1475_v31 = vpop.f32.mrf.mxu3 }
  0xb0   : > { %v1467_v27 = vpop.f32.mrf.mxu0  ;;  %v1469_v28 = vpop.f32.mrf.mxu1 }
  0xb1   : > { %v1237_v29 = vpack.c.bf16 %v1467_v27, %v1454_v24  ;;  %v1257_v30 = vpack.c.bf16 %v1469_v28, %v1456_v25  ;;  %v761_v4 = vmul.f32 %v1540_v59, %v1467_v27 }
  0xb3   : > { %1238 = vst [vmem:[%s1465_s10] sm:$0xff] %v1237_v29   ;;  %v792_v10 = vadd.f32 %v761_v4, %v760_v7  ;;  %v608_v29 = vadd.s32 72, %v1508_v45 }
  0xb4   : > { %1317 = vst [vmem:[%s1465_s10 + $0x20] sm:$0xff] %v1257_v30  }
  0xb5   : > { %vm641_vm9 = vcmp.lt.s32.totalorder %v608_v29, %v1528_v54 }
  0xb7   : > { %v1479_v32 = vpop.f32.mrf.mxu2  ;;  %v1487_v36 = vpop.f32.mrf.mxu3 }
  0xb8   : > { %v1481_v33 = vpop.f32.mrf.mxu0  ;;  %v1483_v34 = vpop.f32.mrf.mxu1  ;;  %v1277_v35 = vpack.c.bf16 %v1479_v32, %v1458_v26  ;;  %v1297_v37 = vpack.c.bf16 %v1487_v36, %v1475_v31 }
  0xb9   : > { %v762_v8 = vmul.f32 %v1558_v3, %v1481_v33 }
  0xba   : > { %1321 = vst [vmem:[%s1465_s10 + $0x40] sm:$0xff] %v1277_v35  }
  0xbb   : > { %1325 = vst [vmem:[%s1465_s10 + $0x60] sm:$0xff] %v1297_v37   ;;  %v793_v19 = vadd.f32 %v792_v10, %v762_v8  ;;  %v609_v37 = vadd.s32 80, %v1508_v45  ;;  %v1637_v8 = vsel %vm641_vm9, 1.0, %v1372_v58  ;;  %v768_v10 = vmul.f32 %v1620_v53, %v1456_v25 }
  0xbc   : > { %v769_v18 = vmul.f32 %v1637_v8, %v1469_v28 }
  0xbd   : > { %vm642_vm10 = vcmp.lt.s32.totalorder %v609_v37, %v1528_v54 }
  0xbf   : > { %v1494_v38 = vpop.f32.mrf.mxu2  ;;  %v1504_v43 = vpop.f32.mrf.mxu3 }
  0xc0   : > { %v1496_v39 = vpop.f32.mrf.mxu0  ;;  %v1498_v40 = vpop.f32.mrf.mxu1  ;;  %1939 = vst [vmem:[#allocation3_spill] sm:$0xff] %v1504_v43 }
  0xc1   : > { %v1242_v41 = vpack.c.bf16 %v1496_v39, %v1481_v33  ;;  %v1262_v42 = vpack.c.bf16 %v1498_v40, %v1483_v34  ;;  %v763_v11 = vmul.f32 %v1566_v6, %v1496_v39 }
  0xc3   : > { %1314 = vst [vmem:[%s1465_s10 + $0x8] sm:$0xff] %v1242_v41   ;;  %v794_v30 = vadd.f32 %v793_v19, %v763_v11  ;;  %v612_v11 = vadd.s32 104, %v1508_v45 }
  0xc4   : > { %1318 = vst [vmem:[%s1465_s10 + $0x28] sm:$0xff] %v1262_v42  }
  0xc5   : > { %vm645_vm13 = vcmp.lt.s32.totalorder %v612_v11, %v1528_v54 }
  0xc7   : > { %v1510_v46 = vpop.f32.mrf.mxu2  ;;  %v1521_v51 = vpop.f32.mrf.mxu3 }
  0xc8   : > { %v1514_v47 = vpop.f32.mrf.mxu0  ;;  %v1516_v48 = vpop.f32.mrf.mxu1  ;;  %v1282_v49 = vpack.c.bf16 %v1510_v46, %v1494_v38  ;;  %1940 = vst [vmem:[#allocation4_spill] sm:$0xff] %v1521_v51  ;;  %v1302_v52 = vpack.c.bf16 %v1521_v51, %v1504_v43 }
  0xc9   : > { %v764_v20 = vmul.f32 %v1575_v9, %v1514_v47 }
  0xca   : > { %1322 = vst [vmem:[%s1465_s10 + $0x48] sm:$0xff] %v1282_v49   ;;  %v610_v49 = vadd.s32 88, %v1508_v45 }
  0xcb   : > { %1326 = vst [vmem:[%s1465_s10 + $0x68] sm:$0xff] %v1302_v52   ;;  %v795_v41 = vadd.f32 %v794_v30, %v764_v20  ;;  %v613_v20 = vadd.s32 112, %v1508_v45 }
  0xcc   : > { %vm643_vm11 = vcmp.lt.s32.totalorder %v610_v49, %v1528_v54  ;;  %v615_v49 = vadd.s32 128, %v1508_v45 }
  0xcd   : > { %vm646_vm14 = vcmp.lt.s32.totalorder %v613_v20, %v1528_v54 }
  0xce   : > { %vm648_vm0 = vcmp.lt.s32.totalorder %v615_v49, %v1528_v54 }
  0xcf   : > { %v1537_v57 = vpop.f32.mrf.mxu2  ;;  %v1552_v1 = vpop.f32.mrf.mxu3 }
  0xd0   : > { %v1542_v60 = vpop.f32.mrf.mxu0  ;;  %v1544_v61 = vpop.f32.mrf.mxu1  ;;  %1941 = vst [vmem:[#allocation5_spill] sm:$0xff] %v1552_v1 }
  0xd1   : > { %v1247_v62 = vpack.c.bf16 %v1542_v60, %v1514_v47  ;;  %v1267_v0 = vpack.c.bf16 %v1544_v61, %v1516_v48  ;;  %v765_v35 = vmul.f32 %v1584_v14, %v1542_v60 }
  0xd3   : > { %1315 = vst [vmem:[%s1465_s10 + $0x10] sm:$0xff] %v1247_v62   ;;  %v796_v50 = vadd.f32 %v795_v41, %v765_v35  ;;  %v614_v35 = vadd.s32 120, %v1508_v45  ;;  %v1662_v41 = vsel %vm644_vm12, 1.0, %v1372_v58 }
  0xd4   : > { %1319 = vst [vmem:[%s1465_s10 + $0x30] sm:$0xff] %v1267_v0  }
  0xd5   : > { %vm647_vm15 = vcmp.lt.s32.totalorder %v614_v35, %v1528_v54 }
  0xd7   : > { %v1581_v13 = vpop.f32.mrf.mxu2  ;;  %v1595_v21 = vpop.f32.mrf.mxu3 }
  0xd8   : > { %v1586_v15 = vpop.f32.mrf.mxu0  ;;  %v1588_v16 = vpop.f32.mrf.mxu1  ;;  %v1287_v17 = vpack.c.bf16 %v1581_v13, %v1537_v57  ;;  %v1307_v23 = vpack.c.bf16 %v1595_v21, %v1552_v1 }
  0xd9   : > { %v766_v42 = vmul.f32 %v1598_v22, %v1586_v15 }
  0xda   : > { %1323 = vst [vmem:[%s1465_s10 + $0x50] sm:$0xff] %v1287_v17   ;;  %v1645_v17 = vsel %vm642_vm10, 1.0, %v1372_v58 }
  0xdb   : > { %1327 = vst [vmem:[%s1465_s10 + $0x70] sm:$0xff] %v1307_v23   ;;  %v797_v63 = vadd.f32 %v796_v50, %v766_v42  ;;  %v1653_v23 = vsel %vm643_vm11, 1.0, %v1372_v58  ;;  %v770_v29 = vmul.f32 %v1645_v17, %v1483_v34 }
  0xdc   : > { %v771_v50 = vmul.f32 %v1653_v23, %v1498_v40 }
  0xdf   : > { %v1617_v52 = vpop.f32.mrf.mxu2  ;;  %v1634_v7 = vpop.f32.mrf.mxu3 }
  0xe0   : > { %v1624_v56 = vpop.f32.mrf.mxu0  ;;  %v1626_v62 = vpop.f32.mrf.mxu1 }
  0xe1   : > { %v1252_v0 = vpack.c.bf16 %v1624_v56, %v1586_v15  ;;  %v767_v4 = vmul.f32 %v1613_v44, %v1624_v56  ;;  %v1272_v5 = vpack.c.bf16 %v1626_v62, %v1588_v16 }
  0xe3   : > { %1316 = vst [vmem:[%s1465_s10 + $0x18] sm:$0xff] %v1252_v0   ;;  %v798_v12 = vadd.f32 %v797_v63, %v767_v4  ;;  %v1673_v0 = vsel %vm645_vm13, 1.0, %v1372_v58 }
  0xe4   : > { %1320 = vst [vmem:[%s1465_s10 + $0x38] sm:$0xff] %v1272_v5   ;;  %v616_v5 = vadd.s32 136, %v1508_v45 }
  0xe5   : > { %v799_v19 = vadd.f32 %v798_v12, %v768_v10  ;;  %v772_v10 = vmul.f32 %v1662_v41, %v1516_v48  ;;  %v1683_v12 = vsel %vm646_vm14, 1.0, %v1372_v58 }
  0xe6   : > { %vm649_vm1 = vcmp.lt.s32.totalorder %v616_v5, %v1528_v54  ;;  %v774_v35 = vmul.f32 %v1683_v12, %v1588_v16 }
  0xe7   : > { %v800_v30 = vadd.f32 %v799_v19, %v769_v18  ;;  %v1659_v37 = vpop.f32.mrf.mxu2  ;;  %v1670_v63 = vpop.f32.mrf.mxu3  ;;  %v617_v18 = vadd.s32 144, %v1508_v45  ;;  %v773_v19 = vmul.f32 %v1673_v0, %v1544_v61 }
  0xe8   : > { %v1292_v42 = vpack.c.bf16 %v1659_v37, %v1617_v52  ;;  %v1312_v4 = vpack.c.bf16 %v1670_v63, %v1634_v7 }
  0xe9   : > { %v801_v55 = vadd.f32 %v800_v30, %v770_v29  ;;  %v1691_v29 = vsel %vm647_vm15, 1.0, %v1372_v58  ;;  %v618_v30 = vadd.s32 152, %v1508_v45  ;;  %vm650_vm2 = vcmp.lt.s32.totalorder %v617_v18, %v1528_v54 }
  0xea   : > { %1324 = vst [vmem:[%s1465_s10 + $0x58] sm:$0xff] %v1292_v42  }
  0xeb   : > { %v802_v11 = vadd.f32 %v801_v55, %v771_v50  ;;  %1328 = vst [vmem:[%s1465_s10 + $0x78] sm:$0xff] %v1312_v4   ;;  %v1698_v50 = vsel %vm648_vm0, 1.0, %v1372_v58  ;;  %v619_v55 = vadd.s32 160, %v1508_v45  ;;  %v775_v4 = vmul.f32 %v1691_v29, %v1626_v62 }
  0xec   : > { %1942 = vst [vmem:[#allocation6_spill] sm:$0xff] %v1691_v29  ;;  %v776_v5 = vmul.f32 %v1698_v50, %v1458_v26  ;;  %vm651_vm3 = vcmp.lt.s32.totalorder %v618_v30, %v1528_v54 }
  0xed   : > { %v803_v20 = vadd.f32 %v802_v11, %v772_v10  ;;  %1943 = vst [vmem:[#allocation7_spill] sm:$0xff] %v1698_v50  ;;  %v1705_v10 = vsel %vm649_vm1, 1.0, %v1372_v58  ;;  %vm652_vm4 = vcmp.lt.s32.totalorder %v619_v55, %v1528_v54  ;;  %v1719_v29 = vsel %vm651_vm3, 1.0, %v1372_v58 }
  0xee   : > { %1944 = vst [vmem:[#allocation8_spill] sm:$0xff] %v1705_v10  ;;  %v777_v18 = vmul.f32 %v1705_v10, %v1479_v32  ;;  %v1726_v50 = vsel %vm652_vm4, 1.0, %v1372_v58  ;;  %v623_v10 = vadd.s32 192, %v1508_v45  ;;  %v779_v55 = vmul.f32 %v1719_v29, %v1510_v46 }
  0xef   : > { %v804_v42 = vadd.f32 %v803_v20, %v773_v19  ;;  %v620_v19 = vadd.s32 168, %v1508_v45  ;;  %v1712_v20 = vsel %vm650_vm2, 1.0, %v1372_v58  ;;  %1946 = vst [vmem:[#allocation10_spill] sm:$0xff] %v1719_v29  ;;  %vm979_vm4 = vcmask 1040384  }
  0xf0   : > { %1945 = vst [vmem:[#allocation9_spill] sm:$0xff] %v1712_v20  ;;  %v778_v30 = vmul.f32 %v1712_v20, %v1494_v38  ;;  %vm656_vm8 = vcmp.lt.s32.totalorder %v623_v10, %v1528_v54 }
  0xf1   : > { %v805_v49 = vadd.f32 %v804_v42, %v774_v35  ;;  %v621_v42 = vadd.s32 176, %v1508_v45  ;;  %vm653_vm5 = vcmp.lt.s32.totalorder %v620_v19, %v1528_v54  ;;  %1947 = vst [vmem:[#allocation11_spill] sm:$0xff] %v1726_v50  ;;  %v780_v19 = vmul.f32 %v1726_v50, %v1537_v57 }
  0xf2   : > { %v1754_v10 = vsel %vm656_vm8, 1.0, %v1372_v58 }
  0xf3   : > { %v806_v11 = vadd.f32 %v805_v49, %v775_v4  ;;  %v622_v4 = vadd.s32 184, %v1508_v45  ;;  %vm654_vm6 = vcmp.lt.s32.totalorder %v621_v42, %v1528_v54  ;;  %1951 = vst [vmem:[#allocation15_spill] sm:$0xff] %v1754_v10 }
  0xf4   : > { %v1740_v20 = vsel %vm654_vm6, 1.0, %v1372_v58 }
  0xf5   : > { %v807_v35 = vadd.f32 %v806_v11, %v776_v5  ;;  %v1733_v11 = vsel %vm653_vm5, 1.0, %v1372_v58  ;;  %vm655_vm7 = vcmp.lt.s32.totalorder %v622_v4, %v1528_v54  ;;  %1949 = vst [vmem:[#allocation13_spill] sm:$0xff] %v1740_v20  ;;  %v782_v4 = vmul.f32 %v1740_v20, %v1617_v52 }
  0xf6   : > { %1948 = vst [vmem:[#allocation12_spill] sm:$0xff] %v1733_v11  ;;  %v781_v42 = vmul.f32 %v1733_v11, %v1581_v13  ;;  %v1747_v29 = vsel %vm655_vm7, 1.0, %v1372_v58  ;;  %v628_v20 = vadd.s32 232, %v1508_v45 }
  0xf7   : > { %v808_v49 = vadd.f32 %v807_v35, %v777_v18  ;;  %v624_v18 = vadd.s32 200, %v1508_v45  ;;  %1950 = vst [vmem:[#allocation14_spill] sm:$0xff] %v1747_v29 }
  0xf8   : > { %vm661_vm13 = vcmp.lt.s32.totalorder %v628_v20, %v1528_v54 }
  0xf9   : > { %v809_v5 = vadd.f32 %v808_v49, %v778_v30  ;;  %v625_v30 = vadd.s32 208, %v1508_v45  ;;  %vm657_vm9 = vcmp.lt.s32.totalorder %v624_v18, %v1528_v54 }
  0xfa   : > { %v1761_v18 = vsel %vm657_vm9, 1.0, %v1372_v58 }
  0xfb   : > { %v810_v35 = vadd.f32 %v809_v5, %v779_v55  ;;  %v626_v55 = vadd.s32 216, %v1508_v45  ;;  %vm658_vm10 = vcmp.lt.s32.totalorder %v625_v30, %v1528_v54  ;;  %1952 = vst [vmem:[#allocation16_spill] sm:$0xff] %v1761_v18 }
  0xfc   : > { %v1768_v11 = vsel %vm658_vm10, 1.0, %v1372_v58 }
  0xfd   : > { %v811_v49 = vadd.f32 %v810_v35, %v780_v19  ;;  %v627_v19 = vadd.s32 224, %v1508_v45  ;;  %v783_v35 = vmul.f32 %v1747_v29, %v1659_v37  ;;  %vm659_vm11 = vcmp.lt.s32.totalorder %v626_v55, %v1528_v54  ;;  %1953 = vst [vmem:[#allocation17_spill] sm:$0xff] %v1768_v11 }
  0xfe   : > { %v1776_v29 = vsel %vm659_vm11, 1.0, %v1372_v58  ;;  %v786_v55 = vmul.f32 %v1768_v11, %v1504_v43 }
  0xff   : > { %v812_v50 = vadd.f32 %v811_v49, %v781_v42  ;;  %v784_v42 = vmul.f32 %v1754_v10, %v1475_v31  ;;  %vm660_vm12 = vcmp.lt.s32.totalorder %v627_v19, %v1528_v54  ;;  %1954 = vst [vmem:[#allocation18_spill] sm:$0xff] %v1776_v29  ;;  %v787_v19 = vmul.f32 %v1776_v29, %v1521_v51 }
 0x100   : > { %v1783_v10 = vsel %vm660_vm12, 1.0, %v1372_v58 }
 0x101   : > { %v813_v5 = vadd.f32 %v812_v50, %v782_v4  ;;  %v785_v50 = vmul.f32 %v1761_v18, %v1487_v36  ;;  %v629_v4 = vadd.s32 240, %v1508_v45  ;;  %1955 = vst [vmem:[#allocation19_spill] sm:$0xff] %v1783_v10  ;;  %v1789_v18 = vsel %vm661_vm13, 1.0, %v1372_v58 }
 0x102   : > { %1956 = vst [vmem:[#allocation20_spill] sm:$0xff] %v1789_v18  ;;  %v789_v20 = vmul.f32 %v1789_v18, %v1595_v21 }
 0x103   : > { %v814_v49 = vadd.f32 %v813_v5, %v783_v35  ;;  %v630_v35 = vadd.s32 248, %v1508_v45  ;;  %vm662_vm14 = vcmp.lt.s32.totalorder %v629_v4, %v1528_v54 }
 0x104   : > { %v1795_v45 = vsel %vm662_vm14, 1.0, %v1372_v58 }
 0x105   : > { %v815_v30 = vadd.f32 %v814_v49, %v784_v42  ;;  %v830_v49 = vstv %s829_s15  ;;  %vm663_vm15 = vcmp.lt.s32.totalorder %v630_v35, %v1528_v54  ;;  %v790_v29 = vmul.f32 %v1795_v45, %v1634_v7 }
 0x106   : > { %1362 = vrcp.f32 %v830_v49  ;;  %v1800_v4 = vsel %vm663_vm15, 1.0, %v1372_v58  ;;  %vm836_vm0 = vweird.f32 %v830_v49  ;;  %v842_v58 = vand.u32 2147483648, %v830_v49 }
 0x107   : > { %v816_v5 = vadd.f32 %v815_v30, %v785_v50  ;;  %v788_v50 = vmul.f32 %v1783_v10, %v1552_v1  ;;  %1957 = vst [vmem:[#allocation21_spill] sm:$0xff] %v1800_v4 }
 0x109   : > { %v817_v42 = vadd.f32 %v816_v5, %v786_v55 }
 0x10b   : > { %v818_v30 = vadd.f32 %v817_v42, %v787_v19  ;;  %v791_v19 = vmul.f32 %v1800_v4, %v1670_v63 }
 0x10c   : > { %v1363_v54 = vpop.eup %1362 }
 0x10d   : > { %v819_v55 = vadd.f32 %v818_v30, %v788_v50  ;;  %v832_v10 = vmul.f32 %v1363_v54, %v830_v49  ;;  %vm837_vm1 = vweird.f32 %v1363_v54 }
 0x10e   : > { %vm838_vm2 = vmor %vm836_vm0, %vm837_vm1 }
 0x10f   : > { %v820_v5 = vadd.f32 %v819_v55, %v789_v20  ;;  %v833_v51 = vsub.f32 1.0, %v832_v10  ;;  %v840_v20 = vand.u32 2147483647, %v830_v49 }
 0x111   : > { %v821_v11 = vadd.f32 %v820_v5, %v790_v29  ;;  %v834_v18 = vmul.f32 %v1363_v54, %v833_v51  ;;  %v843_v29 = vor.u32 1.1754944e-38, %v842_v58  ;;  %vm841_vm3 = vcmp.eq.f32.partialorder %v840_v20, 8.507059e+37 }
 0x113   : > { %v822_v35 = vadd.f32 %v821_v11, %v791_v19  ;;  %v835_v30 = vadd.f32 %v1363_v54, %v834_v18 }
 0x115   : > { %v823_v42 = vrot.slane %v822_v35, 4  ;;  %v839_v5 = vsel %vm838_vm2, %v1363_v54, %v835_v30 }
 0x116   : > { %v844_v11 = vsel %vm841_vm3, %v843_v29, %v839_v5 }
 0x117   : > { %v824_v1 = vadd.f32 %v823_v42, %v822_v35 }
 0x119   : > { %v825_v43 = vrot.slane %v824_v1, 2 }
 0x11b   : > { %v826_v50 = vadd.f32 %v825_v43, %v824_v1 }
 0x11d   : > { %v827_v55 = vrot.slane %v826_v50, 1 }
 0x11f   : > { %v1806_v4 = vadd.f32 %v827_v55, %v826_v50 }
 0x121   : > { %v1809_v19 = vmul.f32 %v844_v11, %v1806_v4 }
 0x123   : > { %v846_v51 = vsub.f32 %v1454_v24, %v1809_v19  ;;  %v847_v43 = vsub.f32 %v1467_v27, %v1809_v19  ;;  %v848_v1 = vsub.f32 %v1481_v33, %v1809_v19  ;;  %v849_v49 = vsub.f32 %v1496_v39, %v1809_v19 }
 0x124   : > { %v850_v54 = vsub.f32 %v1514_v47, %v1809_v19  ;;  %v851_v27 = vsub.f32 %v1542_v60, %v1809_v19  ;;  %v852_v33 = vsub.f32 %v1586_v15, %v1809_v19  ;;  %v853_v39 = vsub.f32 %v1624_v56, %v1809_v19 }
 0x125   : > { %v878_v10 = vmul.f32 %v1555_v2, %v846_v51  ;;  %v879_v18 = vmul.f32 %v1540_v59, %v847_v43  ;;  %v880_v35 = vmul.f32 %v1558_v3, %v848_v1  ;;  %v881_v50 = vmul.f32 %v1566_v6, %v849_v49 }
 0x126   : > { %v882_v59 = vmul.f32 %v1575_v9, %v850_v54  ;;  %v883_v47 = vmul.f32 %v1584_v14, %v851_v27  ;;  %v854_v20 = vsub.f32 %v1456_v25, %v1809_v19  ;;  %v884_v60 = vmul.f32 %v1598_v22, %v852_v33 }
 0x127   : > { %v910_v42 = vmul.f32 %v878_v10, %v878_v10  ;;  %v911_v24 = vmul.f32 %v879_v18, %v879_v18  ;;  %v912_v2 = vmul.f32 %v880_v35, %v880_v35  ;;  %v913_v3 = vmul.f32 %v881_v50, %v881_v50 }
 0x128   : > { %v914_v6 = vmul.f32 %v882_v59, %v882_v59  ;;  %v855_v15 = vsub.f32 %v1469_v28, %v1809_v19  ;;  %v885_v9 = vmul.f32 %v1613_v44, %v853_v39  ;;  %v915_v29 = vmul.f32 %v883_v47, %v883_v47 }
 0x129   : > { %v942_v58 = vadd.f32 %v911_v24, %v910_v42  ;;  %v856_v56 = vsub.f32 %v1483_v34, %v1809_v19  ;;  %v886_v14 = vmul.f32 %v1620_v53, %v854_v20  ;;  %v916_v11 = vmul.f32 %v884_v60, %v884_v60 }
 0x12a   : > { %v857_v25 = vsub.f32 %v1498_v40, %v1809_v19  ;;  %v887_v22 = vmul.f32 %v1637_v8, %v855_v15  ;;  %v917_v43 = vmul.f32 %v885_v9, %v885_v9  ;;  %v858_v28 = vsub.f32 %v1516_v48, %v1809_v19 }
 0x12b   : > { %v943_v30 = vadd.f32 %v942_v58, %v912_v2  ;;  %v888_v44 = vmul.f32 %v1645_v17, %v856_v56  ;;  %v918_v10 = vmul.f32 %v886_v14, %v886_v14  ;;  %v859_v34 = vsub.f32 %v1544_v61, %v1809_v19 }
 0x12c   : > { %v889_v53 = vmul.f32 %v1653_v23, %v857_v25  ;;  %v919_v49 = vmul.f32 %v887_v22, %v887_v22  ;;  %v860_v40 = vsub.f32 %v1588_v16, %v1809_v19  ;;  %v890_v8 = vmul.f32 %v1662_v41, %v858_v28  ;;  %v1958_v41 = vld [vmem:[#allocation6_spill] sm:$0xff] }
 0x12d   : > { %v944_v55 = vadd.f32 %v943_v30, %v913_v3  ;;  %v920_v35 = vmul.f32 %v888_v44, %v888_v44  ;;  %v861_v48 = vsub.f32 %v1626_v62, %v1809_v19  ;;  %v891_v17 = vmul.f32 %v1673_v0, %v859_v34  ;;  %v1959_v0 = vld [vmem:[#allocation7_spill] sm:$0xff] }
 0x12e   : > { %v921_v24 = vmul.f32 %v889_v53, %v889_v53  ;;  %v862_v61 = vsub.f32 %v1458_v26, %v1809_v19  ;;  %v892_v23 = vmul.f32 %v1683_v12, %v860_v40  ;;  %v922_v50 = vmul.f32 %v890_v8, %v890_v8  ;;  %v1960_v12 = vld [vmem:[#allocation8_spill] sm:$0xff] }
 0x12f   : > { %v945_v5 = vadd.f32 %v944_v55, %v914_v6  ;;  %v863_v16 = vsub.f32 %v1479_v32, %v1809_v19  ;;  %v893_v59 = vmul.f32 %v1958_v41, %v861_v48  ;;  %v923_v2 = vmul.f32 %v891_v17, %v891_v17  ;;  %v1961_v6 = vld [vmem:[#allocation9_spill] sm:$0xff] }
 0x130   : > { %v864_v62 = vsub.f32 %v1494_v38, %v1809_v19  ;;  %v894_v39 = vmul.f32 %v1959_v0, %v862_v61  ;;  %v924_v47 = vmul.f32 %v892_v23, %v892_v23  ;;  %v865_v26 = vsub.f32 %v1510_v46, %v1809_v19  ;;  %v1970_v61 = vld [vmem:[#allocation16_spill] sm:$0xff]  ;;  %v1972_v41 = vld [vmem:[#allocation17_spill] sm:$0xff]  ;;  %v1973_v0 = vld [vmem:[#allocation18_spill] sm:$0xff] }
 0x131   : > { %v946_v51 = vadd.f32 %v945_v5, %v915_v29  ;;  %v895_v30 = vmul.f32 %v1960_v12, %v863_v16  ;;  %v925_v20 = vmul.f32 %v893_v59, %v893_v59  ;;  %v866_v32 = vsub.f32 %v1537_v57, %v1809_v19  ;;  %v1962_v29 = vld [vmem:[#allocation10_spill] sm:$0xff]  ;;  %v1974_v12 = vld [vmem:[#allocation19_spill] sm:$0xff] }
 0x132   : > { %v896_v55 = vmul.f32 %v1961_v6, %v864_v62  ;;  %v926_v15 = vmul.f32 %v894_v39, %v894_v39  ;;  %v867_v38 = vsub.f32 %v1581_v13, %v1809_v19  ;;  %v897_v5 = vmul.f32 %v1962_v29, %v865_v26  ;;  %v1975_v6 = vld [vmem:[#allocation20_spill] sm:$0xff] }
 0x133   : > { %v947_v1 = vadd.f32 %v946_v51, %v916_v11  ;;  %v927_v56 = vmul.f32 %v895_v30, %v895_v30  ;;  %v868_v46 = vsub.f32 %v1617_v52, %v1809_v19  ;;  %v1963_v11 = vld [vmem:[#allocation11_spill] sm:$0xff]  ;;  %v869_v57 = vsub.f32 %v1659_v37, %v1809_v19 }
 0x134   : > { %v898_v51 = vmul.f32 %v1963_v11, %v866_v32  ;;  %v928_v25 = vmul.f32 %v896_v55, %v896_v55  ;;  %v929_v28 = vmul.f32 %v897_v5, %v897_v5  ;;  %v870_v13 = vsub.f32 %v1475_v31, %v1809_v19  ;;  %v1967_v37 = vld [vmem:[#allocation3_spill] sm:$0xff]  ;;  %v1969_v31 = vld [vmem:[#allocation4_spill] sm:$0xff]  ;;  %v1976_v5 = vld [vmem:[#allocation21_spill] sm:$0xff] }
 0x135   : > { %v948_v18 = vadd.f32 %v947_v1, %v917_v43  ;;  %v1964_v43 = vld [vmem:[#allocation12_spill] sm:$0xff]  ;;  %v871_v52 = vsub.f32 %v1487_v36, %v1809_v19  ;;  %v1971_v36 = vld [vmem:[#allocation5_spill] sm:$0xff]  ;;  %v875_v62 = vsub.f32 %v1595_v21, %v1809_v19  ;;  %v876_v26 = vsub.f32 %v1634_v7, %v1809_v19 }
 0x136   : > { %v899_v1 = vmul.f32 %v1964_v43, %v867_v38  ;;  %v930_v34 = vmul.f32 %v898_v51, %v898_v51  ;;  %v874_v16 = vsub.f32 %v1971_v36, %v1809_v19  ;;  %v877_v32 = vsub.f32 %v1670_v63, %v1809_v19 }
 0x137   : > { %v949_v54 = vadd.f32 %v948_v18, %v918_v10  ;;  %v1965_v10 = vld [vmem:[#allocation13_spill] sm:$0xff]  ;;  %v903_v23 = vmul.f32 %v1970_v61, %v871_v52  ;;  %v907_v55 = vmul.f32 %v1975_v6, %v875_v62 }
 0x138   : > { %v900_v18 = vmul.f32 %v1965_v10, %v868_v46  ;;  %v931_v40 = vmul.f32 %v899_v1, %v899_v1  ;;  %v906_v30 = vmul.f32 %v1974_v12, %v874_v16 }
 0x139   : > { %v950_v42 = vadd.f32 %v949_v54, %v919_v49  ;;  %v1966_v49 = vld [vmem:[#allocation14_spill] sm:$0xff]  ;;  %v939_v7 = vmul.f32 %v907_v55, %v907_v55 }
 0x13a   : > { %v901_v54 = vmul.f32 %v1966_v49, %v869_v57  ;;  %v932_v17 = vmul.f32 %v900_v18, %v900_v18  ;;  %v938_v38 = vmul.f32 %v906_v30, %v906_v30 }
 0x13b   : > { %v951_v27 = vadd.f32 %v950_v42, %v920_v35  ;;  %v872_v35 = vsub.f32 %v1967_v37, %v1809_v19  ;;  %v1968_v42 = vld [vmem:[#allocation15_spill] sm:$0xff] }
 0x13c   : > { %v902_v48 = vmul.f32 %v1968_v42, %v870_v13 }
 0x13d   : > { %v952_v33 = vadd.f32 %v951_v27, %v921_v24  ;;  %v873_v27 = vsub.f32 %v1969_v31, %v1809_v19  ;;  %v904_v59 = vmul.f32 %v1972_v41, %v872_v35 }
 0x13f   : > { %v953_v58 = vadd.f32 %v952_v33, %v922_v50  ;;  %v933_v50 = vmul.f32 %v901_v54, %v901_v54  ;;  %v905_v39 = vmul.f32 %v1973_v0, %v873_v27 }
 0x141   : > { %v954_v3 = vadd.f32 %v953_v58, %v923_v2  ;;  %v934_v2 = vmul.f32 %v902_v48, %v902_v48 }
 0x143   : > { %v955_v60 = vadd.f32 %v954_v3, %v924_v47  ;;  %v935_v47 = vmul.f32 %v903_v23, %v903_v23 }
 0x145   : > { %v956_v9 = vadd.f32 %v955_v60, %v925_v20  ;;  %v936_v20 = vmul.f32 %v904_v59, %v904_v59 }
 0x147   : > { %v957_v14 = vadd.f32 %v956_v9, %v926_v15  ;;  %v937_v15 = vmul.f32 %v905_v39, %v905_v39  ;;  %v908_v9 = vmul.f32 %v1795_v45, %v876_v26 }
 0x149   : > { %v958_v22 = vadd.f32 %v957_v14, %v927_v56  ;;  %v909_v56 = vmul.f32 %v1976_v5, %v877_v32  ;;  %v940_v46 = vmul.f32 %v908_v9, %v908_v9 }
 0x14b   : > { %v959_v44 = vadd.f32 %v958_v22, %v928_v25  ;;  %v941_v51 = vmul.f32 %v909_v56, %v909_v56 }
 0x14d   : > { %v960_v53 = vadd.f32 %v959_v44, %v929_v28 }
 0x14f   : > { %v961_v8 = vadd.f32 %v960_v53, %v930_v34 }
 0x151   : > { %v962_v24 = vadd.f32 %v961_v8, %v931_v40 }
 0x153   : > { %v963_v33 = vadd.f32 %v962_v24, %v932_v17 }
 0x155   : > { %v964_v58 = vadd.f32 %v963_v33, %v933_v50 }
 0x157   : > { %v965_v3 = vadd.f32 %v964_v58, %v934_v2 }
 0x159   : > { %v966_v60 = vadd.f32 %v965_v3, %v935_v47 }
 0x15b   : > { %v967_v21 = vadd.f32 %v966_v60, %v936_v20 }
 0x15d   : > { %v968_v29 = vadd.f32 %v967_v21, %v937_v15 }
 0x15f   : > { %v969_v14 = vadd.f32 %v968_v29, %v938_v38 }
 0x161   : > { %v970_v11 = vadd.f32 %v969_v14, %v939_v7 }
 0x163   : > { %v971_v25 = vadd.f32 %v970_v11, %v940_v46 }
 0x165   : > { %v972_v22 = vadd.f32 %v971_v25, %v941_v51 }
 0x167   : > { %v973_v63 = vrot.slane %v972_v22, 4 }
 0x169   : > { %v974_v19 = vadd.f32 %v973_v63, %v972_v22 }
 0x16b   : > { %v975_v57 = vrot.slane %v974_v19, 2 }
 0x16d   : > { %v976_v43 = vadd.f32 %v975_v57, %v974_v19 }
 0x16f   : > { %v977_v1 = vrot.slane %v976_v43, 1 }
 0x171   : > { %v978_v45 = vadd.f32 %v977_v1, %v976_v43 }
 0x173   : > { %v980_v28 = vsel %vm979_vm4, %v1806_v4, %v978_v45 }
 0x174   : > { %981 = vst [vmem:[%s184_s19] sm:$0x3] %v980_v28 }
 0x175 PF: > { %s14_s12 = sadd.s32 1, %s1370_s12  }
 0x176   : > { %p11_p6 = scmp.ge.s32.totalorder %s14_s12, 4  }
 0x178   :  { %13 = sbr.rel (!%p11_p6) target bundleno = 1 (0x1), region = 70 }

</bundles_post_ra>
